<compile_context>
chip_gen: v5e
topology: v5e:2x2
jax: 0.10.0
libtpu: 0.0.40
codegen_flags: <defaults>
</compile_context>

<pallas_src>
import functools

import jax
import jax.numpy as jnp
from jax.experimental import pallas as pl
from jax.experimental.pallas import tpu as pltpu

IN_FEATURES = 28 * 28   # 784
HIDDEN = 32
OUT_FEATURES = 10

H_PAD = 128             # lane-dense hidden width (MXU-friendly, cheap in bytes)


def _round_up(x, m):
    return (x + m - 1) // m * m


def mlp_kernel(x_ref, w1_ref, b1_ref, w2_ref, b2_ref, w3_ref, b3_ref, o_ref):
    # x arrives as f32 straight from HBM; cast to bf16 only for the MXU feed.
    x = x_ref[...].astype(jnp.bfloat16)                       # (TB, 784)
    # layer 1: (TB, 784) bf16 @ (784, 128) bf16 -> f32 acc; bias + relu in f32,
    # downcast fused into the relu for the next MXU feed.
    h1 = jnp.dot(x, w1_ref[...], preferred_element_type=jnp.float32)
    h1 = jnp.maximum(h1 + b1_ref[...], 0.0).astype(jnp.bfloat16)
    # layer 2: (TB, 128) @ (128, 128)
    h2 = jnp.dot(h1, w2_ref[...], preferred_element_type=jnp.float32)
    h2 = jnp.maximum(h2 + b2_ref[...], 0.0).astype(jnp.bfloat16)
    # layer 3: (TB, 128) @ (128, 10) -- narrow (10-lane) f32 output store
    out = jnp.dot(h2, w3_ref[...], preferred_element_type=jnp.float32)
    o_ref[...] = out + b3_ref[...]


def init_params(key):
    """Deterministic init matching nn.Linear shapes (weights stored (in, out))."""
    k1, k2, k3, k4, k5, k6 = jax.random.split(key, 6)

    def linear_init(kw, kb, fan_in, fan_out):
        bound = 1.0 / jnp.sqrt(fan_in)
        w = jax.random.uniform(kw, (fan_in, fan_out), jnp.float32, -bound, bound)
        b = jax.random.uniform(kb, (1, fan_out), jnp.float32, -bound, bound)
        return w, b

    w1, b1 = linear_init(k1, k2, IN_FEATURES, HIDDEN)
    w2, b2 = linear_init(k3, k4, HIDDEN, HIDDEN)
    w3, b3 = linear_init(k5, k6, HIDDEN, OUT_FEATURES)
    return (w1, b1, w2, b2, w3, b3)


def pad_and_cast_params(params):
    """One-time conversion to the padded, bf16 layout the kernel expects."""
    w1, b1, w2, b2, w3, b3 = params
    # Hidden width padded 32 -> 128 (zero padding is numerically inert).
    w1p = jnp.zeros((IN_FEATURES, H_PAD), jnp.bfloat16)
    w1p = w1p.at[:, :HIDDEN].set(w1.astype(jnp.bfloat16))
    b1p = jnp.zeros((1, H_PAD), jnp.float32).at[:, :HIDDEN].set(b1)
    w2p = jnp.zeros((H_PAD, H_PAD), jnp.bfloat16)
    w2p = w2p.at[:HIDDEN, :HIDDEN].set(w2.astype(jnp.bfloat16))
    b2p = jnp.zeros((1, H_PAD), jnp.float32).at[:, :HIDDEN].set(b2)
    # Output stays at its true width (10); only real bias lanes exist.
    w3p = jnp.zeros((H_PAD, OUT_FEATURES), jnp.bfloat16)
    w3p = w3p.at[:HIDDEN, :].set(w3.astype(jnp.bfloat16))
    b3p = b3.astype(jnp.float32)                                # (1, 10)
    return (w1p, b1p, w2p, b2p, w3p, b3p)


@functools.partial(jax.jit, static_argnames=("tb",))
def net_forward(x_nchw, padded_params, *, tb=1024):
    """x_nchw: (B, 1, 28, 28) float32.  Returns logits (B, 10) float32."""
    w1p, b1p, w2p, b2p, w3p, b3p = padded_params
    B = x_nchw.shape[0]
    x = x_nchw.reshape(B, -1)                  # torch.flatten(x, 1); f32, no pad/cast

    TB = min(tb, _round_up(B, 8))              # batch tile (sublane-aligned)
    grid = (pl.cdiv(B, TB),)                   # partial last block masked by Pallas

    wconst = lambda a: pl.BlockSpec(a.shape, lambda i: (0, 0))

    flops = 2 * B * (IN_FEATURES * H_PAD + H_PAD * H_PAD + H_PAD * OUT_FEATURES)
    bytes_accessed = (
        B * IN_FEATURES * 4                                   # f32 x read
        + sum(int(p.size) * p.dtype.itemsize for p in padded_params)
        + B * OUT_FEATURES * 4)                               # f32 logits write

    out = pl.pallas_call(
        mlp_kernel,
        out_shape=jax.ShapeDtypeStruct((B, OUT_FEATURES), jnp.float32),
        grid=grid,
        in_specs=[
            pl.BlockSpec((TB, IN_FEATURES), lambda i: (i, 0)),  # pipelined f32 x tile
            wconst(w1p), wconst(b1p),
            wconst(w2p), wconst(b2p),
            wconst(w3p), wconst(b3p),
        ],
        out_specs=pl.BlockSpec((TB, OUT_FEATURES), lambda i: (i, 0)),
        compiler_params=pltpu.CompilerParams(
            dimension_semantics=("parallel",)),                 # megacore-shardable
        cost_estimate=pl.CostEstimate(
            flops=flops, transcendentals=0, bytes_accessed=bytes_accessed),
    )(x, w1p, b1p, w2p, b2p, w3p, b3p)

    return out


def reference_forward(x_nchw, params):
    """Pure-f32 reference (matches the PyTorch module exactly)."""
    w1, b1, w2, b2, w3, b3 = params
    x = x_nchw.reshape(x_nchw.shape[0], -1)
    h1 = jnp.maximum(x @ w1 + b1, 0.0)
    h2 = jnp.maximum(h1 @ w2 + b2, 0.0)
    return h2 @ w3 + b3


def reference_forward_bf16(x_nchw, params):
    """Reference with the same bf16-input / f32-accumulate precision as the kernel."""
    w1, b1, w2, b2, w3, b3 = params
    x = x_nchw.reshape(x_nchw.shape[0], -1).astype(jnp.bfloat16)
    h1 = jnp.dot(x, w1.astype(jnp.bfloat16), preferred_element_type=jnp.float32)
    h1 = jnp.maximum(h1 + b1, 0.0)
    h2 = jnp.dot(h1.astype(jnp.bfloat16), w2.astype(jnp.bfloat16),
                 preferred_element_type=jnp.float32)
    h2 = jnp.maximum(h2 + b2, 0.0)
    out = jnp.dot(h2.astype(jnp.bfloat16), w3.astype(jnp.bfloat16),
                  preferred_element_type=jnp.float32)
    return out + b3


if __name__ == "__main__":
    key = jax.random.PRNGKey(0)
    kx, kp = jax.random.split(key)

    params = init_params(kp)
    kparams = pad_and_cast_params(params)

    # Small MNIST-like batch (NCHW), single grid step.
    B = 8
    x = jax.random.normal(kx, (B, 1, 28, 28), jnp.float32)
    out = jax.block_until_ready(net_forward(x, kparams))
    assert out.shape == (B, 10), out.shape

    ref_bf16 = reference_forward_bf16(x, params)
    ref_f32 = reference_forward(x, params)
    err_bf16 = float(jnp.max(jnp.abs(out - ref_bf16)))
    err_f32 = float(jnp.max(jnp.abs(out - ref_f32)))
    assert err_bf16 < 1e-2, f"bf16-matched max err {err_bf16}"
    assert err_f32 < 1e-1, f"f32-reference max err {err_f32}"

    # Multi-tile grid with a ragged batch (exercises pipelining + the masked
    # partial last block: 600 rows, TB=512 -> grid of 2, last block 88 rows).
    B2 = 600
    x2 = jax.random.normal(kx, (B2, 1, 28, 28), jnp.float32)
    out2 = jax.block_until_ready(net_forward(x2, kparams, tb=512))
    assert out2.shape == (B2, 10), out2.shape
    err2 = float(jnp.max(jnp.abs(out2 - reference_forward_bf16(x2, params))))
    assert err2 < 1e-2, f"multi-tile max err {err2}"

    print("KERNEL_OK")
</pallas_src>

<mosaic_0001>
module attributes {stable_mosaic.version = 11 : i64} {
  func.func @mlp_kernel(%arg0: i32, %arg1: memref<8x784xf32, #tpu.memory_space<vmem>>, %arg2: memref<784x128xbf16, #tpu.memory_space<vmem>>, %arg3: memref<1x128xf32, #tpu.memory_space<vmem>>, %arg4: memref<128x128xbf16, #tpu.memory_space<vmem>>, %arg5: memref<1x128xf32, #tpu.memory_space<vmem>>, %arg6: memref<128x10xbf16, #tpu.memory_space<vmem>>, %arg7: memref<1x10xf32, #tpu.memory_space<vmem>>, %arg8: memref<8x10xf32, #tpu.memory_space<vmem>>) attributes {dimension_semantics = [#tpu.dimension_semantics<parallel>], iteration_bounds = array<i64: 1>, scalar_prefetch = 0 : i64, scratch_operands = 0 : i64, tpu.core_type = #tpu.core_type<tc>, window_params = [{transform_indices = @transform_0, window_bounds = array<i64: 8, 784>}, {pipeline_mode = #tpu.pipeline_mode<synchronous>, transform_indices = @transform_1, window_bounds = array<i64: 784, 128>}, {pipeline_mode = #tpu.pipeline_mode<synchronous>, transform_indices = @transform_2, window_bounds = array<i64: 1, 128>}, {pipeline_mode = #tpu.pipeline_mode<synchronous>, transform_indices = @transform_3, window_bounds = array<i64: 128, 128>}, {pipeline_mode = #tpu.pipeline_mode<synchronous>, transform_indices = @transform_4, window_bounds = array<i64: 1, 128>}, {pipeline_mode = #tpu.pipeline_mode<synchronous>, transform_indices = @transform_5, window_bounds = array<i64: 128, 10>}, {pipeline_mode = #tpu.pipeline_mode<synchronous>, transform_indices = @transform_6, window_bounds = array<i64: 1, 10>}, {transform_indices = @transform_7, window_bounds = array<i64: 8, 10>}]} {
    %c0 = arith.constant 0 : index
    %c0_0 = arith.constant 0 : index
    %0 = vector.load %arg1[%c0, %c0_0] : memref<8x784xf32, #tpu.memory_space<vmem>>, vector<8x784xf32>
    %1 = arith.truncf %0 : vector<8x784xf32> to vector<8x784xbf16>
    %c0_1 = arith.constant 0 : index
    %c0_2 = arith.constant 0 : index
    %2 = vector.load %arg2[%c0_1, %c0_2] : memref<784x128xbf16, #tpu.memory_space<vmem>>, vector<784x128xbf16>
    %cst = arith.constant dense<0.000000e+00> : vector<8x128xf32>
    %3 = tpu.matmul %1, %2, %cst {dimension_numbers = #tpu.dot_dimension_numbers<[1], [0], [0], [1], [0, 0, 1, 1], [], []>} : vector<8x784xbf16>, vector<784x128xbf16>, vector<8x128xf32> -> vector<8x128xf32>
    %c0_3 = arith.constant 0 : index
    %c0_4 = arith.constant 0 : index
    %4 = vector.load %arg3[%c0_3, %c0_4] : memref<1x128xf32, #tpu.memory_space<vmem>>, vector<1x128xf32>
    %5 = vector.broadcast %4 : vector<1x128xf32> to vector<8x128xf32>
    %6 = arith.addf %3, %5 : vector<8x128xf32>
    %cst_5 = arith.constant 0.000000e+00 : f32
    %7 = vector.broadcast %cst_5 : f32 to vector<8x128xf32>
    %8 = arith.maximumf %6, %7 : vector<8x128xf32>
    %9 = arith.truncf %8 : vector<8x128xf32> to vector<8x128xbf16>
    %c0_6 = arith.constant 0 : index
    %c0_7 = arith.constant 0 : index
    %10 = vector.load %arg4[%c0_6, %c0_7] : memref<128x128xbf16, #tpu.memory_space<vmem>>, vector<128x128xbf16>
    %cst_8 = arith.constant dense<0.000000e+00> : vector<8x128xf32>
    %11 = tpu.matmul %9, %10, %cst_8 {dimension_numbers = #tpu.dot_dimension_numbers<[1], [0], [0], [1], [0, 0, 1, 1], [], []>} : vector<8x128xbf16>, vector<128x128xbf16>, vector<8x128xf32> -> vector<8x128xf32>
    %c0_9 = arith.constant 0 : index
    %c0_10 = arith.constant 0 : index
    %12 = vector.load %arg5[%c0_9, %c0_10] : memref<1x128xf32, #tpu.memory_space<vmem>>, vector<1x128xf32>
    %13 = vector.broadcast %12 : vector<1x128xf32> to vector<8x128xf32>
    %14 = arith.addf %11, %13 : vector<8x128xf32>
    %cst_11 = arith.constant 0.000000e+00 : f32
    %15 = vector.broadcast %cst_11 : f32 to vector<8x128xf32>
    %16 = arith.maximumf %14, %15 : vector<8x128xf32>
    %17 = arith.truncf %16 : vector<8x128xf32> to vector<8x128xbf16>
    %c0_12 = arith.constant 0 : index
    %c0_13 = arith.constant 0 : index
    %18 = vector.load %arg6[%c0_12, %c0_13] : memref<128x10xbf16, #tpu.memory_space<vmem>>, vector<128x10xbf16>
    %cst_14 = arith.constant dense<0.000000e+00> : vector<8x10xf32>
    %19 = tpu.matmul %17, %18, %cst_14 {dimension_numbers = #tpu.dot_dimension_numbers<[1], [0], [0], [1], [0, 0, 1, 1], [], []>} : vector<8x128xbf16>, vector<128x10xbf16>, vector<8x10xf32> -> vector<8x10xf32>
    %c0_15 = arith.constant 0 : index
    %c0_16 = arith.constant 0 : index
    %20 = vector.load %arg7[%c0_15, %c0_16] : memref<1x10xf32, #tpu.memory_space<vmem>>, vector<1x10xf32>
    %21 = vector.broadcast %20 : vector<1x10xf32> to vector<8x10xf32>
    %22 = arith.addf %19, %21 : vector<8x10xf32>
    %c0_17 = arith.constant 0 : index
    %c0_18 = arith.constant 0 : index
    %23 = vector.load %arg8[%c0_17, %c0_18] : memref<8x10xf32, #tpu.memory_space<vmem>>, vector<8x10xf32>
    tpu.vector_store %arg8[%c0_17, %c0_18], %22 {strides = array<i32>} : memref<8x10xf32, #tpu.memory_space<vmem>>, vector<8x10xf32>,
    return
  }
  func.func @transform_0(%arg0: i32) -> (i32, i32) {
    %c0_i32 = arith.constant 0 : i32
    %c0_i32_0 = arith.constant 0 : i32
    return %arg0, %c0_i32 : i32, i32
  }
  func.func @transform_1(%arg0: i32) -> (i32, i32) {
    %c0_i32 = arith.constant 0 : i32
    %c0_i32_0 = arith.constant 0 : i32
    %c0_i32_1 = arith.constant 0 : i32
    return %c0_i32, %c0_i32_0 : i32, i32
  }
  func.func @transform_2(%arg0: i32) -> (i32, i32) {
    %c0_i32 = arith.constant 0 : i32
    %c0_i32_0 = arith.constant 0 : i32
    %c0_i32_1 = arith.constant 0 : i32
    return %c0_i32, %c0_i32_0 : i32, i32
  }
  func.func @transform_3(%arg0: i32) -> (i32, i32) {
    %c0_i32 = arith.constant 0 : i32
    %c0_i32_0 = arith.constant 0 : i32
    %c0_i32_1 = arith.constant 0 : i32
    return %c0_i32, %c0_i32_0 : i32, i32
  }
  func.func @transform_4(%arg0: i32) -> (i32, i32) {
    %c0_i32 = arith.constant 0 : i32
    %c0_i32_0 = arith.constant 0 : i32
    %c0_i32_1 = arith.constant 0 : i32
    return %c0_i32, %c0_i32_0 : i32, i32
  }
  func.func @transform_5(%arg0: i32) -> (i32, i32) {
    %c0_i32 = arith.constant 0 : i32
    %c0_i32_0 = arith.constant 0 : i32
    %c0_i32_1 = arith.constant 0 : i32
    return %c0_i32, %c0_i32_0 : i32, i32
  }
  func.func @transform_6(%arg0: i32) -> (i32, i32) {
    %c0_i32 = arith.constant 0 : i32
    %c0_i32_0 = arith.constant 0 : i32
    %c0_i32_1 = arith.constant 0 : i32
    return %c0_i32, %c0_i32_0 : i32, i32
  }
  func.func @transform_7(%arg0: i32) -> (i32, i32) {
    %c0_i32 = arith.constant 0 : i32
    %c0_i32_0 = arith.constant 0 : i32
    return %arg0, %c0_i32 : i32, i32
  }
}

</mosaic_0001>

<bundles_post_ra>
// kernel: net_forward.1
= control target key start
LH: loop header
LB: loop body
LE: loop exit
PB: predicated region body
PF: predicated region fallthrough
CT: control target
= control target key end

     0   :  { %s1342_s0 = inlined_call_operand.vmem [shape: f32[8,784], index: 0, kind: input, shape index: {}]   ;;  %s1343_s1 = inlined_call_operand.vmem [shape: bf16[784,128], index: 1, kind: input, shape index: {}]   ;;  %s1344_s2 = inlined_call_operand.vmem [shape: f32[1,128], index: 2, kind: input, shape index: {}]   ;;  %s1345_s3 = inlined_call_operand.vmem [shape: bf16[128,128], index: 3, kind: input, shape index: {}]   ;;  %s1346_s4 = inlined_call_operand.vmem [shape: f32[1,128], index: 4, kind: input, shape index: {}]   ;;  %s1347_s5 = inlined_call_operand.vmem [shape: bf16[128,10], index: 5, kind: input, shape index: {}]   ;;  %s1348_s6 = inlined_call_operand.vmem [shape: f32[1,10], index: 6, kind: input, shape index: {}]   ;;  %s1349_s7 = inlined_call_operand.hbm [shape: f32[8,10], index: 7, kind: output, shape index: {}]  }
   0x1   :  { %v985_v0 = vld [vmem:[%s1343_s1 + $0x38] sm:$0xff]  ;;  %v984_v3 = vld [vmem:[%s1343_s1 + $0x30] sm:$0xff]  ;;  %v983_v8 = vld [vmem:[%s1343_s1 + $0x28] sm:$0xff] }
   0x2   :  { %v993_v1 = vld [vmem:[%s1343_s1 + $0x78] sm:$0xff]  ;;  %442 = vmatpush.bf16.msra.mxu0 %v985_v0  ;;  %v992_v4 = vld [vmem:[%s1343_s1 + $0x70] sm:$0xff]  ;;  %v991_v9 = vld [vmem:[%s1343_s1 + $0x68] sm:$0xff] }
   0x3   :  { %v1001_v2 = vld [vmem:[%s1343_s1 + $0xb8] sm:$0xff]  ;;  %455 = vmatpush.bf16.msra.mxu1 %v993_v1  ;;  %v1000_v5 = vld [vmem:[%s1343_s1 + $0xb0] sm:$0xff]  ;;  %v999_v10 = vld [vmem:[%s1343_s1 + $0xa8] sm:$0xff] }
   0x4   :  { %468 = vmatpush.bf16.msra.mxu2 %v1001_v2  ;;  %v1009_v6 = vld [vmem:[%s1343_s1 + $0xf8] sm:$0xff]  ;;  %v1008_v7 = vld [vmem:[%s1343_s1 + $0xf0] sm:$0xff]  ;;  %v1007_v11 = vld [vmem:[%s1343_s1 + $0xe8] sm:$0xff] }
   0x5   :  { %481 = vmatpush.bf16.msra.mxu3 %v1009_v6  ;;  %v982_v12 = vld [vmem:[%s1343_s1 + $0x20] sm:$0xff]  ;;  %v981_v16 = vld [vmem:[%s1343_s1 + $0x18] sm:$0xff] }
   0x6   :  { %443 = vmatpush.bf16.msra.mxu0 %v984_v3  ;;  %v990_v13 = vld [vmem:[%s1343_s1 + $0x60] sm:$0xff]  ;;  %v989_v17 = vld [vmem:[%s1343_s1 + $0x58] sm:$0xff] }
   0x7   :  { %456 = vmatpush.bf16.msra.mxu1 %v992_v4  ;;  %v998_v14 = vld [vmem:[%s1343_s1 + $0xa0] sm:$0xff]  ;;  %v997_v18 = vld [vmem:[%s1343_s1 + $0x98] sm:$0xff] }
   0x8   :  { %469 = vmatpush.bf16.msra.mxu2 %v1000_v5  ;;  %v1006_v15 = vld [vmem:[%s1343_s1 + $0xe0] sm:$0xff]  ;;  %v1005_v19 = vld [vmem:[%s1343_s1 + $0xd8] sm:$0xff] }
   0x9   :  { %482 = vmatpush.bf16.msra.mxu3 %v1008_v7 }
   0xa   :  { %444 = vmatpush.bf16.msra.mxu0 %v983_v8 }
   0xb   :  { %457 = vmatpush.bf16.msra.mxu1 %v991_v9 }
   0xc   :  { %470 = vmatpush.bf16.msra.mxu2 %v999_v10 }
   0xd   :  { %483 = vmatpush.bf16.msra.mxu3 %v1007_v11 }
   0xe   :  { %445 = vmatpush.bf16.msra.mxu0 %v982_v12 }
   0xf   :  { %458 = vmatpush.bf16.msra.mxu1 %v990_v13 }
  0x10   :  { %471 = vmatpush.bf16.msra.mxu2 %v998_v14 }
  0x11   :  { %484 = vmatpush.bf16.msra.mxu3 %v1006_v15 }
  0x12   :  { %12 = vsyncpa [#allocation3], 0  ;;  %446 = vmatpush.bf16.msra.mxu0 %v981_v16  ;;  %v980_v20 = vld [vmem:[%s1343_s1 + $0x10] sm:$0xff]  ;;  %v979_v24 = vld [vmem:[%s1343_s1 + $0x8] sm:$0xff]  ;;  %vm438_vm0 = vcmask 130048   ;;  %s1073_s30 = smov [#allocation2]  }
  0x13   :  { %459 = vmatpush.bf16.msra.mxu1 %v989_v17  ;;  %v988_v21 = vld [vmem:[%s1343_s1 + $0x50] sm:$0xff]  ;;  %v987_v25 = vld [vmem:[%s1343_s1 + $0x48] sm:$0xff]  ;;  %v978_v27 = vld [vmem:[%s1343_s1] sm:$0xff]  ;;  %s706_s8 = sshll.u32 %s1073_s30, 4  ;;  %vm699_vm1 = vcmask 80896   ;;  %s707_s8 = int_to_ptr.vmem [resolvable:$true] %s706_s8 }
  0x14   :  { %472 = vmatpush.bf16.msra.mxu2 %v997_v18  ;;  %v996_v22 = vld [vmem:[%s1343_s1 + $0x90] sm:$0xff]  ;;  %v995_v26 = vld [vmem:[%s1343_s1 + $0x88] sm:$0xff]  ;;  %v986_v29 = vld [vmem:[%s1343_s1 + $0x40] sm:$0xff] }
  0x15   :  { %485 = vmatpush.bf16.msra.mxu3 %v1005_v19  ;;  %v1004_v23 = vld [vmem:[%s1343_s1 + $0xd0] sm:$0xff]  ;;  %v1003_v28 = vld [vmem:[%s1343_s1 + $0xc8] sm:$0xff]  ;;  %v28_v30 = vld [vmem:[%s1342_s0] sm:$0xff] }
  0x16   :  { %447 = vmatpush.bf16.msra.mxu0 %v980_v20  ;;  %v29_v31 = vld [vmem:[%s1342_s0 + $0x8] sm:$0xff]  ;;  %v1017_v32 = vld [vmem:[%s1343_s1 + $0x138] sm:$0xff]  ;;  %v994_v34 = vld [vmem:[%s1343_s1 + $0x80] sm:$0xff]  ;;  %v35_v36 = vpack.c.bf16 %v28_v30, %v28_v30 }
  0x17   :  { %460 = vmatpush.bf16.msra.mxu1 %v988_v21  ;;  %v1025_v33 = vld [vmem:[%s1343_s1 + $0x178] sm:$0xff]  ;;  %v30_v35 = vld [vmem:[%s1342_s0 + $0x10] sm:$0xff]  ;;  %v36_v37 = vpack.c.bf16 %v29_v31, %v29_v31  ;;  %v1002_v38 = vld [vmem:[%s1343_s1 + $0xc0] sm:$0xff] }
  0x18   :  { %473 = vmatpush.bf16.msra.mxu2 %v996_v22  ;;  %v1026_v39 = vld [vmem:[%s1343_s1 + $0x180] sm:$0xff]  ;;  %v31_v40 = vld [vmem:[%s1342_s0 + $0x18] sm:$0xff]  ;;  %v1016_v41 = vld [vmem:[%s1343_s1 + $0x130] sm:$0xff]  ;;  %v37_v43 = vpack.c.bf16 %v30_v35, %v30_v35 }
  0x19   :  { %486 = vmatpush.bf16.msra.mxu3 %v1004_v23  ;;  %v1024_v42 = vld [vmem:[%s1343_s1 + $0x170] sm:$0xff]  ;;  %v38_v44 = vpack.c.bf16 %v31_v40, %v31_v40  ;;  %v1015_v45 = vld [vmem:[%s1343_s1 + $0x128] sm:$0xff]  ;;  %v1014_v47 = vld [vmem:[%s1343_s1 + $0x120] sm:$0xff] }
  0x1a   :  { %448 = vmatpush.bf16.msra.mxu0 %v979_v24  ;;  %v1023_v46 = vld [vmem:[%s1343_s1 + $0x168] sm:$0xff]  ;;  %v1022_v48 = vld [vmem:[%s1343_s1 + $0x160] sm:$0xff]  ;;  %v1013_v49 = vld [vmem:[%s1343_s1 + $0x118] sm:$0xff] }
  0x1b   :  { %461 = vmatpush.bf16.msra.mxu1 %v987_v25  ;;  %v1021_v50 = vld [vmem:[%s1343_s1 + $0x158] sm:$0xff]  ;;  %v34_v51 = vld [vmem:[%s1342_s0 + $0x30] sm:$0xff]  ;;  %v1011_v55 = vld [vmem:[%s1343_s1 + $0x108] sm:$0xff] }
  0x1c   :  { %474 = vmatpush.bf16.msra.mxu2 %v995_v26  ;;  %v1012_v52 = vld [vmem:[%s1343_s1 + $0x110] sm:$0xff]  ;;  %v41_v54 = vpack.c.bf16 %v34_v51, %v34_v51  ;;  %v1019_v56 = vld [vmem:[%s1343_s1 + $0x148] sm:$0xff]  ;;  %v1010_v57 = vld [vmem:[%s1343_s1 + $0x100] sm:$0xff] }
  0x1d   :  { %487 = vmatpush.bf16.msra.mxu3 %v1003_v28  ;;  %v1020_v53 = vld [vmem:[%s1343_s1 + $0x150] sm:$0xff]  ;;  %v1018_v58 = vld [vmem:[%s1343_s1 + $0x140] sm:$0xff]  ;;  %v33_v60 = vld [vmem:[%s1342_s0 + $0x28] sm:$0xff] }
  0x1e   :  { %449 = vmatpush.bf16.msra.mxu0 %v978_v27  ;;  %v32_v59 = vld [vmem:[%s1342_s0 + $0x20] sm:$0xff]  ;;  %v40_v62 = vpack.c.bf16 %v33_v60, %v33_v60  ;;  %v1034_v63 = vld [vmem:[%s1345_s3 + $0x38] sm:$0xff]  ;;  %v1033_v0 = vld [vmem:[%s1345_s3 + $0x30] sm:$0xff] }
  0x1f   :  { %462 = vmatpush.bf16.msra.mxu1 %v986_v29  ;;  %v39_v61 = vpack.c.bf16 %v32_v59, %v32_v59  ;;  %v1032_v1 = vld [vmem:[%s1345_s3 + $0x28] sm:$0xff]  ;;  %v1031_v2 = vld [vmem:[%s1345_s3 + $0x20] sm:$0xff]  ;;  %v1030_v3 = vld [vmem:[%s1345_s3 + $0x18] sm:$0xff] }
  0x20   :  { %475 = vmatpush.bf16.msra.mxu2 %v994_v34  ;;  %v1029_v4 = vld [vmem:[%s1345_s3 + $0x10] sm:$0xff]  ;;  %v1028_v5 = vld [vmem:[%s1345_s3 + $0x8] sm:$0xff]  ;;  %v1027_v8 = vld [vmem:[%s1345_s3] sm:$0xff] }
  0x21   :  { %450 = vmatmul.bf16.vlgmr.msra.gmra.mxu0 %v35_v36  ;;  %488 = vmatpush.bf16.msra.mxu3 %v1002_v38  ;;  %v1042_v11 = vld [vmem:[%s1347_s5 + $0x38] sm:$0xff]  ;;  %v1041_v14 = vld [vmem:[%s1347_s5 + $0x30] sm:$0xff]  ;;  %v1044_v15 = vld [vmem:[%s1344_s2] ss:$0 sm:$0xff] }
  0x22   :  { %494 = vmatpush.bf16.msrb.mxu0 %v1017_v32  ;;  %463 = vmatmul.bf16.vlgmr.msra.gmra.mxu1 %v36_v37  ;;  %v1040_v16 = vld [vmem:[%s1347_s5 + $0x28] sm:$0xff]  ;;  %v1039_v20 = vld [vmem:[%s1347_s5 + $0x20] sm:$0xff]  ;;  %v1038_v22 = vld [vmem:[%s1347_s5 + $0x18] sm:$0xff] }
  0x23   :  { %507 = vmatpush.bf16.msrb.mxu1 %v1025_v33  ;;  %476 = vmatmul.bf16.vlgmr.msra.gmra.mxu2 %v37_v43  ;;  %v1037_v25 = vld [vmem:[%s1347_s5 + $0x10] sm:$0xff]  ;;  %v1036_v37 = vld [vmem:[%s1347_s5 + $0x8] sm:$0xff]  ;;  %v1035_v38 = vld [vmem:[%s1347_s5] sm:$0xff]  ;;  %s708_s5 = sshll.u32 %s1349_s7, 4  ;;  %s709_s5 = int_to_ptr.hbm [resolvable:$true] %s708_s5 }
  0x24   :  { %527 = vmatpush.bf16.msrb.mxu2 %v1026_v39  ;;  %489 = vmatmul.bf16.vlgmr.msra.gmra.mxu3 %v38_v44  ;;  %v1045_v39 = vld [vmem:[%s1346_s4] ss:$0 sm:$0xff] }
  0x25   :  { %603 = vmatpush.bf16.msrb.mxu3 %v1034_v63 }
  0x26   :  { %495 = vmatpush.bf16.msrb.mxu0 %v1016_v41 }
  0x27   :  { %508 = vmatpush.bf16.msrb.mxu1 %v1024_v42 }
  0x28   :  { %686 = vmatpush.bf16.msra.mxu2 %v1042_v11 }
  0x29   :  { %604 = vmatpush.bf16.msrb.mxu3 %v1033_v0 }
  0x2a   :  { %496 = vmatpush.bf16.msrb.mxu0 %v1015_v45  ;;  %v1046_v45 = vld [vmem:[%s1348_s6] ss:$0 sm:$0xff] }
  0x2b   :  { %509 = vmatpush.bf16.msrb.mxu1 %v1023_v46 }
  0x2c   :  { %687 = vmatpush.bf16.msra.mxu2 %v1041_v14 }
  0x2d   :  { %605 = vmatpush.bf16.msrb.mxu3 %v1032_v1 }
  0x2e   :  { %497 = vmatpush.bf16.msrb.mxu0 %v1014_v47 }
  0x2f   :  { %510 = vmatpush.bf16.msrb.mxu1 %v1022_v48 }
  0x30   :  { %688 = vmatpush.bf16.msra.mxu2 %v1040_v16 }
  0x31   :  { %606 = vmatpush.bf16.msrb.mxu3 %v1031_v2 }
  0x32   :  { %498 = vmatpush.bf16.msrb.mxu0 %v1013_v49 }
  0x33   :  { %511 = vmatpush.bf16.msrb.mxu1 %v1021_v50  ;;  %913 = vmatmul.msk.bf16.vlgmr.msrb.gmra.mxu2 %vm438_vm0, %v41_v54 }
  0x34   :  { %689 = vmatpush.bf16.msra.mxu2 %v1039_v20 }
  0x35   :  { %607 = vmatpush.bf16.msrb.mxu3 %v1030_v3 }
  0x36   :  { %499 = vmatpush.bf16.msrb.mxu0 %v1012_v52 }
  0x37   :  { %512 = vmatpush.bf16.msrb.mxu1 %v1020_v53 }
  0x38   :  { %690 = vmatpush.bf16.msra.mxu2 %v1038_v22 }
  0x39   :  { %608 = vmatpush.bf16.msrb.mxu3 %v1029_v4 }
  0x3a   :  { %500 = vmatpush.bf16.msrb.mxu0 %v1011_v55 }
  0x3b   :  { %513 = vmatpush.bf16.msrb.mxu1 %v1019_v56 }
  0x3c   :  { %691 = vmatpush.bf16.msra.mxu2 %v1037_v25 }
  0x3d   :  { %609 = vmatpush.bf16.msrb.mxu3 %v1028_v5 }
  0x3e   :  { %501 = vmatpush.bf16.msrb.mxu0 %v1010_v57 }
  0x3f   :  { %514 = vmatpush.bf16.msrb.mxu1 %v1018_v58 }
  0x40   :  { %692 = vmatpush.bf16.msra.mxu2 %v1036_v37 }
  0x41   :  { %502 = vmatmul.bf16.vlgmr.msrb.gmra.mxu0 %v39_v61  ;;  %610 = vmatpush.bf16.msrb.mxu3 %v1027_v8 }
  0x42   :  { %515 = vmatmul.bf16.vlgmr.msrb.gmra.mxu1 %v40_v62 }
  0x44   :  { %693 = vmatpush.bf16.msra.mxu2 %v1035_v38 }
  0x9e   :  { %v451_v6 = vpop.f32.mrf.mxu0 }
  0x9f   :  { %v464_v7 = vpop.f32.mrf.mxu1  ;;  %v452_v17 = vadd.f32 %v1044_v15, %v451_v6 }
  0xa1   :  { %v465_v21 = vadd.f32 %v464_v7, %v452_v17 }
  0xa6   :  { %v453_v9 = vpop.f32.mrf.mxu0  ;;  %v477_v12 = vpop.f32.mrf.mxu2 }
  0xa7   :  { %v466_v10 = vpop.f32.mrf.mxu1  ;;  %v490_v13 = vpop.f32.mrf.mxu3  ;;  %v478_v23 = vadd.f32 %v477_v12, %v465_v21 }
  0xa9   :  { %v491_v26 = vadd.f32 %v490_v13, %v478_v23 }
  0xae   :  { %v479_v18 = vpop.f32.mrf.mxu2 }
  0xaf   :  { %v492_v19 = vpop.f32.mrf.mxu3 }
  0xb6   :  { %v529_v24 = vpop.f32.mrf.mxu2 }
  0xbe   :  { %v503_v27 = vpop.f32.mrf.mxu0  ;;  %v531_v31 = vpop.f32.mrf.mxu2 }
  0xbf   :  { %v516_v28 = vpop.f32.mrf.mxu1  ;;  %v504_v29 = vadd.f32 %v503_v27, %v491_v26 }
  0xc1   :  { %v517_v30 = vadd.f32 %v516_v28, %v504_v29 }
  0xc3   :  { %v530_v32 = vadd.f32 %v529_v24, %v517_v30 }
  0xc5   :  { %v533_v33 = vmax.f32 %v530_v32, 0.0 }
  0xc6   :  { %v505_v34 = vpop.f32.mrf.mxu0 }
  0xc7   :  { %v518_v35 = vpop.f32.mrf.mxu1  ;;  %v534_v36 = vpack.c.bf16 %v533_v33, %v533_v33 }
  0xc9   :  { %611 = vmatmul.bf16.vlgmr.msrb.gmra.mxu3 %v534_v36 }
 0x14c   :  { %v612_v40 = vpop.f32.mrf.mxu3 }
 0x14d   :  { %v613_v41 = vadd.f32 %v1045_v39, %v612_v40 }
 0x14f   :  { %v616_v42 = vmax.f32 %v613_v41, 0.0 }
 0x151   :  { %v617_v43 = vpack.c.bf16 %v616_v42, %v616_v42 }
 0x153   :  { %694 = vmatmul.bf16.vlgmr.msra.gmra.mxu2 %v617_v43 }
 0x154   :  { %v614_v44 = vpop.f32.mrf.mxu3 }
 0x1d6   :  { %v695_v46 = vpop.f32.mrf.mxu2 }
 0x1d7   :  { %v696_v47 = vadd.f32 %v1046_v45, %v695_v46 }
 0x1d9   :  { %700 = vst.msk [vmem:[#allocation2] sm:$0xff] %vm699_vm1, %v696_v47 }
 0x1da   :  { %711 = dma.vmem_to_hbm [thread:$0]  %s707_s8, 128, %s709_s5, [#allocation3]  }
 0x1de   :  { %v697_v48 = vpop.f32.mrf.mxu2 }
 0x1df   :  { %1071 = dma.done.wait [#allocation3], 128  }
 0x1e0   :  { %1072 = vsyncadd [#allocation3], 4294967168 }
 0x1e1   :  { %716 = vsyncpa [#allocation3], 1 }

</bundles_post_ra>
